<compile_context>
chip_gen: v7x
topology: tpu7x:2x2x1
jax: 0.10.0
libtpu: 0.0.40
codegen_flags: <defaults>
</compile_context>

<pallas_src>
import functools

import jax
import jax.numpy as jnp
from jax.experimental import pallas as pl
from jax.experimental.pallas import tpu as pltpu


def _lsr_kernel(logits_ref, targets_ref, out_ref, *,
                epsilon, n_true, c_true, tile_n):
    i = pl.program_id(0)

    x = logits_ref[...].astype(jnp.float32)       # (TILE_N, C_pad) f32 compute
    t = targets_ref[...]                          # (TILE_N, 1) int32
    tn, c_pad = x.shape

    lo = epsilon / (c_true - 1)                   # off-target smoothing weight
    hi = lo + (1.0 - epsilon)                     # target weight
    s_total = (1.0 - epsilon) + c_true * lo       # sum_c w_c

    col = jax.lax.broadcasted_iota(jnp.int32, (tn, c_pad), 1)

    lane_masked = (c_pad != c_true)               # static (trace-time) branch
    if lane_masked:
        valid = col < c_true
        x = jnp.where(valid, x, -jnp.inf)         # pad lanes can't win the max

    # Numerically-stable log-softmax pieces (no (N, C) log_sm materialized).
    m = jnp.max(x, axis=1, keepdims=True)         # (TILE_N, 1)
    shifted = x - m                               # (TILE_N, C_pad)
    lse = jnp.log(jnp.sum(jnp.exp(shifted), axis=1, keepdims=True))

    # Single fused weighted reduction over the class dim:
    #   loss_i = -sum_c w_c * (shifted - lse) = S*lse - sum_c w_c * shifted
    w = jnp.where(col == t, hi, lo)               # (TILE_N, C_pad)
    prod = w * shifted
    if lane_masked:
        prod = jnp.where(valid, prod, 0.0)        # drop pad-lane contributions
    wsum = jnp.sum(prod, axis=1, keepdims=True)   # (TILE_N, 1)

    per_row = s_total * lse - wsum                # (TILE_N, 1)

    # Zero padded rows; the wrapper divides by the true N exactly once.
    row = jax.lax.broadcasted_iota(jnp.int32, (tn, 1), 0) + i * tile_n
    per_row = jnp.where(row < n_true, per_row, 0.0)

    tile_sum = jnp.sum(per_row)                   # scalar f32
    # Lane-dense (1, 8, 128) output block, value replicated across the block.
    out_ref[...] = jnp.full(out_ref.shape, tile_sum, dtype=jnp.float32)


def _vmem_budget():
    """Generation-aware (working-set budget, scoped VMEM limit) in bytes."""
    vmem_cap = 64 * 1024 * 1024
    try:
        info = pltpu.get_tpu_info()
        vmem_cap = int(getattr(info, "vmem_capacity_bytes", vmem_cap))
    except Exception:
        pass
    if vmem_cap >= 96 * 1024 * 1024:
        # v5e / v6e: 128 MiB physical VMEM -> big tiles, ~96 MiB scoped limit.
        return 40 * 1024 * 1024, 96 * 1024 * 1024
    # v7x: 64 MiB per TC -> tighter accounting, ~40 MiB scoped limit.
    return 16 * 1024 * 1024, 40 * 1024 * 1024


def lsr_loss(logits, targets, epsilon=0.1, tile_n=512):
    """logits: (N, C) float (any dtype); targets: (N,) int class indices.

    Returns scalar f32 label-smoothed NLL (mean over rows).
    """
    N, C = logits.shape
    assert C >= 2, "LSR needs at least 2 classes (eps/(C-1) divides by C-1)."

    itemsize = jnp.dtype(logits.dtype).itemsize
    sub = {4: 8, 2: 16, 1: 32}.get(itemsize, 8)   # native sublane tile

    budget, vmem_limit = _vmem_budget()
    c_pad = ((C + 127) // 128) * 128              # lane-dense class dim

    # 2 double-buffered native-dtype DMA tiles + ~3 live f32 (TILE_N, C) temps.
    per_row_bytes = c_pad * (2 * itemsize + 12)
    max_rows = max(sub, budget // max(per_row_bytes, 1))
    tile_n = int(min(tile_n, max_rows))

    # Keep >= 2 grid tiles when N allows (megacore / v7x second TC).
    half = ((pl.cdiv(N, 2) + sub - 1) // sub) * sub
    tile_n = min(tile_n, max(sub, half))

    tile_n = max(sub, (tile_n // sub) * sub)      # sublane-aligned
    if N < tile_n:
        tile_n = max(sub, ((N + sub - 1) // sub) * sub)

    num_tiles = pl.cdiv(N, tile_n)
    n_pad = num_tiles * tile_n

    targets2d = targets.astype(jnp.int32).reshape(N, 1)
    if n_pad != N or c_pad != C:
        logits = jnp.pad(logits, ((0, n_pad - N), (0, c_pad - C)))
        targets2d = jnp.pad(targets2d, ((0, n_pad - N), (0, 0)))

    kernel = functools.partial(
        _lsr_kernel, epsilon=float(epsilon), n_true=N, c_true=C, tile_n=tile_n)

    cost = pl.CostEstimate(
        flops=6 * n_pad * c_pad,
        transcendentals=n_pad * c_pad,
        bytes_accessed=n_pad * c_pad * itemsize + n_pad * 4
                       + num_tiles * 8 * 128 * 4)

    partial = pl.pallas_call(
        kernel,
        out_shape=jax.ShapeDtypeStruct((num_tiles, 8, 128), jnp.float32),
        grid=(num_tiles,),
        in_specs=[
            # Native-dtype logits tile, full (lane-dense, 128-padded) class dim.
            pl.BlockSpec((tile_n, c_pad), lambda i: (i, 0)),
            pl.BlockSpec((tile_n, 1), lambda i: (i, 0)),
        ],
        out_specs=pl.BlockSpec((1, 8, 128), lambda i: (i, 0, 0)),
        compiler_params=pltpu.CompilerParams(
            dimension_semantics=("parallel",),     # shard batch across TCs
            vmem_limit_bytes=vmem_limit),
        cost_estimate=cost,
    )(logits, targets2d)

    # Each (8,128) block is the tile's partial sum replicated 1024x:
    # sum the whole slab (no strided gather) and divide once.
    return jnp.sum(partial) / jnp.float32(1024 * N)


def _reference(logits, targets, epsilon=0.1):
    N, C = logits.shape
    log_sm = jax.nn.log_softmax(logits.astype(jnp.float32), axis=1)
    onehot = jnp.where(
        jax.lax.broadcasted_iota(jnp.int32, (N, C), 1) == targets.reshape(N, 1),
        1.0 - epsilon, 0.0) + epsilon / (C - 1)
    return jnp.mean(-jnp.sum(onehot * log_sm, axis=1))


if __name__ == "__main__":
    key = jax.random.PRNGKey(0)
    k1, k2, k3, k4 = jax.random.split(key, 4)

    # Case 1: small, single tile, class dim padded 32 -> 128 (lane masking).
    N1, C1 = 8, 32
    logits1 = jax.random.normal(k1, (N1, C1), dtype=jnp.float32)
    targets1 = jax.random.randint(k2, (N1,), 0, C1, dtype=jnp.int32)
    loss1 = lsr_loss(logits1, targets1, epsilon=0.1)
    jax.block_until_ready(loss1)
    ref1 = _reference(logits1, targets1, epsilon=0.1)
    assert jnp.allclose(loss1, ref1, rtol=1e-5, atol=1e-5), (loss1, ref1)

    # Case 2: multi-tile grid with row padding + masking (N=20, tile_n=8)
    # and class dim padded 160 -> 256.
    N2, C2 = 20, 160
    logits2 = jax.random.normal(k3, (N2, C2), dtype=jnp.float32)
    targets2 = jax.random.randint(k4, (N2,), 0, C2, dtype=jnp.int32)
    loss2 = lsr_loss(logits2, targets2, epsilon=0.1, tile_n=8)
    jax.block_until_ready(loss2)
    ref2 = _reference(logits2, targets2, epsilon=0.1)
    assert jnp.allclose(loss2, ref2, rtol=1e-5, atol=1e-5), (loss2, ref2)

    print("KERNEL_OK")
</pallas_src>

<mosaic_0001>
module attributes {stable_mosaic.version = 11 : i64} {
  func.func @_lsr_kernel(%arg0: i32, %arg1: memref<8x128xf32, #tpu.memory_space<vmem>>, %arg2: memref<8x1xi32, #tpu.memory_space<vmem>>, %arg3: memref<1x8x128xf32, #tpu.memory_space<vmem>>) attributes {dimension_semantics = [#tpu.dimension_semantics<parallel>], iteration_bounds = array<i64: 1>, scalar_prefetch = 0 : i64, scratch_operands = 0 : i64, tpu.core_type = #tpu.core_type<tc>, window_params = [{transform_indices = @transform_0, window_bounds = array<i64: 8, 128>}, {transform_indices = @transform_1, window_bounds = array<i64: 8, 1>}, {transform_indices = @transform_2, window_bounds = array<i64: 1, 8, 128>}]} {
    %c0 = arith.constant 0 : index
    %c0_0 = arith.constant 0 : index
    %0 = vector.load %arg1[%c0, %c0_0] : memref<8x128xf32, #tpu.memory_space<vmem>>, vector<8x128xf32>
    %c0_1 = arith.constant 0 : index
    %c0_2 = arith.constant 0 : index
    %1 = vector.load %arg2[%c0_1, %c0_2] : memref<8x1xi32, #tpu.memory_space<vmem>>, vector<8x1xi32>
    %2 = tpu.iota {dimensions = array<i32: 1>} : vector<8x128xi32>
    %c32_i32 = arith.constant 32 : i32
    %3 = vector.broadcast %c32_i32 : i32 to vector<8x128xi32>
    %4 = arith.cmpi slt, %2, %3 : vector<8x128xi32>
    %cst = arith.constant 0xFF800000 : f32
    %5 = vector.broadcast %cst : f32 to vector<8x128xf32>
    %6 = arith.select %4, %0, %5 : vector<8x128xi1>, vector<8x128xf32>
    %cst_3 = arith.constant dense<0xFF800000> : vector<8xf32>
    %7 = vector.multi_reduction <maximumf>, %6, %cst_3 [1] : vector<8x128xf32> to vector<8xf32>
    %8 = vector.shape_cast %7 : vector<8xf32> to vector<8x1xf32>
    %9 = vector.broadcast %8 : vector<8x1xf32> to vector<8x128xf32>
    %10 = arith.subf %6, %9 : vector<8x128xf32>
    %11 = math.exp %10 : vector<8x128xf32>
    %cst_4 = arith.constant dense<0.000000e+00> : vector<8xf32>
    %12 = vector.multi_reduction <add>, %11, %cst_4 [1] : vector<8x128xf32> to vector<8xf32>
    %13 = vector.shape_cast %12 : vector<8xf32> to vector<8x1xf32>
    %14 = math.log %13 : vector<8x1xf32>
    %15 = vector.broadcast %1 : vector<8x1xi32> to vector<8x128xi32>
    %16 = arith.cmpi eq, %2, %15 : vector<8x128xi32>
    %cst_5 = arith.constant 0.903225779 : f32
    %cst_6 = arith.constant 0.0032258064 : f32
    %17 = vector.broadcast %cst_5 : f32 to vector<8x128xf32>
    %18 = vector.broadcast %cst_6 : f32 to vector<8x128xf32>
    %19 = arith.select %16, %17, %18 : vector<8x128xi1>, vector<8x128xf32>
    %20 = arith.mulf %19, %10 : vector<8x128xf32>
    %cst_7 = arith.constant 0.000000e+00 : f32
    %21 = vector.broadcast %cst_7 : f32 to vector<8x128xf32>
    %22 = arith.select %4, %20, %21 : vector<8x128xi1>, vector<8x128xf32>
    %cst_8 = arith.constant dense<0.000000e+00> : vector<8xf32>
    %23 = vector.multi_reduction <add>, %22, %cst_8 [1] : vector<8x128xf32> to vector<8xf32>
    %24 = vector.shape_cast %23 : vector<8xf32> to vector<8x1xf32>
    %cst_9 = arith.constant 1.0032258 : f32
    %25 = vector.broadcast %cst_9 : f32 to vector<8x1xf32>
    %26 = arith.mulf %25, %14 : vector<8x1xf32>
    %27 = arith.subf %26, %24 : vector<8x1xf32>
    %28 = tpu.iota {dimensions = array<i32: 0>} : vector<8x1xi32>
    %c8_i32 = arith.constant 8 : i32
    %29 = arith.muli %arg0, %c8_i32 : i32
    %30 = vector.broadcast %29 : i32 to vector<8x1xi32>
    %31 = arith.addi %28, %30 : vector<8x1xi32>
    %c8_i32_10 = arith.constant 8 : i32
    %32 = vector.broadcast %c8_i32_10 : i32 to vector<8x1xi32>
    %33 = arith.cmpi slt, %31, %32 : vector<8x1xi32>
    %cst_11 = arith.constant 0.000000e+00 : f32
    %34 = vector.broadcast %cst_11 : f32 to vector<8x1xf32>
    %35 = arith.select %33, %27, %34 : vector<8x1xi1>, vector<8x1xf32>
    %36 = vector.shape_cast %35 : vector<8x1xf32> to vector<1x8x1xf32>
    %cst_12 = arith.constant dense<0.000000e+00> : vector<1xf32>
    %37 = vector.multi_reduction <add>, %36, %cst_12 [1, 2] : vector<1x8x1xf32> to vector<1xf32>
    %38 = vector.shape_cast %37 : vector<1xf32> to vector<1x1x1xf32>
    %39 = vector.extract %38[0, 0, 0] : f32 from vector<1x1x1xf32>
    %40 = vector.broadcast %39 : f32 to vector<1x8x128xf32>
    %c0_13 = arith.constant 0 : index
    %c0_14 = arith.constant 0 : index
    %c0_15 = arith.constant 0 : index
    %41 = vector.load %arg3[%c0_13, %c0_14, %c0_15] : memref<1x8x128xf32, #tpu.memory_space<vmem>>, vector<1x8x128xf32>
    tpu.vector_store %arg3[%c0_13, %c0_14, %c0_15], %40 {strides = array<i32>} : memref<1x8x128xf32, #tpu.memory_space<vmem>>, vector<1x8x128xf32>,
    return
  }
  func.func @transform_0(%arg0: i32) -> (i32, i32) {
    %c0_i32 = arith.constant 0 : i32
    %c0_i32_0 = arith.constant 0 : i32
    return %arg0, %c0_i32 : i32, i32
  }
  func.func @transform_1(%arg0: i32) -> (i32, i32) {
    %c0_i32 = arith.constant 0 : i32
    %c0_i32_0 = arith.constant 0 : i32
    return %arg0, %c0_i32 : i32, i32
  }
  func.func @transform_2(%arg0: i32) -> (i32, i32, i32) {
    %c0_i32 = arith.constant 0 : i32
    %c0_i32_0 = arith.constant 0 : i32
    %c0_i32_1 = arith.constant 0 : i32
    return %arg0, %c0_i32, %c0_i32_0 : i32, i32, i32
  }
}

</mosaic_0001>

<bundles_post_ra>
// kernel: tpu_custom_call.1
= control target key start
LH: loop header
LB: loop body
LE: loop exit
PB: predicated region body
PF: predicated region fallthrough
CT: control target
= control target key end

     0   :  { %v14_v0 = vlaneseq  ;;  %s144_s0 = inlined_call_operand.vmem [shape: f32[8,128], index: 0, kind: input, shape index: {}]   ;;  %s145_s1 = inlined_call_operand.vmem [shape: s32[8,1], index: 1, kind: input, shape index: {}]   ;;  %s146_s2 = inlined_call_operand.hbm [shape: f32[1,8,128], index: 2, kind: output, shape index: {}]  }
   0x1   :  { %7 = vsyncpa [#allocation3], 0  ;;  %v106_v1 = vmov 0   ;;  %v12_v2 = vld [vmem:[%s144_s0] sm:$0xff]  ;;  %v107_v10 = vmov 0.0032258064  }
   0x2   :  { %77 = vset.pattern.permute.xlu0 %v106_v1  ;;  %v15_v3 = vand.u32 127, %v14_v0  ;;  %v13_v5 = vld [vmem:[%s145_s1] sm:$0xff]  ;;  %vm45_vm2 = vcmask 7168   ;;  %s108_s0 = smov [#allocation2]  }
   0x3   :  { %s64_s1 = sshll.u32 %s108_s0, 4  ;;  %s65_s1 = int_to_ptr.vmem [resolvable:$true] %s64_s1 }
   0x4   :  { %vm16_vm0 = vcmp.lt.s32.totalorder %v15_v3, 32  ;;  %s82_s14 = scalar_lea.vmem %s65_s1, 128  ;;  %p87_p1 = scmp.lt.s32.totalorder %s65_s1, %s65_s1 }
   0x5   :  { %v17_v4 = vsel %vm16_vm0, %v12_v2, -inf  ;;  %p83_p0 = scmp.ne.s32.totalorder %s65_s1, %s82_s14  ;;  %p88_p2 = scmp.lt.s32.totalorder %s82_s14, %s82_s14 }
   0x6   :  { %18 = vmax.xlane.f32.xlu0 %v17_v4 }
   0x7   :  { %p89_p3 = por %p88_p2, %p87_p1 }
   0x9   :  { %p90_p4 = pnand %p89_p3, %p83_p0 }
  0x1c   :  { %28 = vperm.xlu0 %77, %v13_v5  }
  0x93   :  { %v19_v6 = vpop.xlane.xlu0 %18 }
  0x94   :  { %v20_v7 = vsub.f32 %v17_v4, %v19_v6 }
  0x96   :  { %v21_v8 = vmul.f32 1.442695, %v20_v7 }
  0x98   :  { %78 = vpow2.f32 %v21_v8 }
  0x9b   :  { %v29_v9 = vpop.permute.xlu0 %28 }
  0x9c   :  { %vm30_vm1 = vcmp.eq.s32.totalorder %v15_v3, %v29_v9 }
  0x9d   :  { %v31_v11 = vsel %vm30_vm1, 0.9032258, %v107_v10 }
  0x9e   :  { %v32_v13 = vmul.f32 %v31_v11, %v20_v7 }
  0xa0   :  { %v33_v14 = vsel %vm16_vm0, %v32_v13, 0.0 }
  0xa2   :  { %v79_v12 = vpop.eup %78 }
  0xa3   :  { %23 = vadd.xlane.f32.xlu1 %v79_v12 }
  0xa7   :  { %34 = vadd.xlane.f32.xlu1 %v33_v14 }
 0x130   :  { %v24_v15 = vpop.xlane.xlu1 %23 }
 0x131   :  { %80 = vlog2.f32 %v24_v15 }
 0x134   :  { %v35_v19 = vpop.xlane.xlu1 %34 }
 0x13b   :  { %v81_v16 = vpop.eup %80 }
 0x13c   :  { %v26_v17 = vmul.f32 0.6931472, %v81_v16 }
 0x13e   :  { %v36_v18 = vmul.f32 1.0032258, %v26_v17 }
 0x140   :  { %v37_v20 = vsub.f32 %v36_v18, %v35_v19 }
 0x142   :  { %v46_v21 = vsel %vm45_vm2, %v37_v20, 0.0 }
 0x143   :  { %47 = vadd.xlane.f32.xlu1 %v46_v21 }
 0x1d0   :  { %v48_v22 = vpop.xlane.xlu1 %47 }
 0x1d1   :  { %v49_v23 = vrot.slane %v48_v22, 4 }
 0x1d3   :  { %v50_v24 = vadd.f32 %v49_v23, %v48_v22 }
 0x1d5   :  { %v51_v25 = vrot.slane %v50_v24, 2 }
 0x1d7   :  { %v52_v26 = vadd.f32 %v51_v25, %v50_v24 }
 0x1d9   :  { %v53_v27 = vrot.slane %v52_v26, 1 }
 0x1db   :  { %v54_v28 = vadd.f32 %v53_v27, %v52_v26 }
 0x1dd   :  { %72 = vpush %v54_v28 }
 0x20e   :  { %s73_s13 = spop %72 }
 0x20f   :  { %v56_v29 = vstv %s73_s13 }
 0x210   :  { %57 = vst [vmem:[#allocation2] sm:$0xff] %v56_v29 }
 0x211   :  { %93 = shalt.err (!%p90_p4)
}
 0x212   :  { %s94_s17 = scalar_lea.hbm %s146_s2, 128 }
 0x213   :  { %p95_p5 = scmp.ne.s32.totalorder %s146_s2, %s94_s17  ;;  %p98_p6 = scmp.lt.u32.totalorder %s94_s17, %s146_s2 }
 0x215   :  { %p100_p7 = pnand %p98_p6, %p95_p5 }
 0x217   :  { %103 = shalt.err (!%p100_p7)
}
 0x218   :  { %67 = dma.vmem_to_hbm [thread:$0]  %s65_s1, 128, %s146_s2, [#allocation3]  }
 0x219   :  { %104 = dma.done.wait [#allocation3], 128  }
 0x21a   :  { %105 = vsyncadd [#allocation3], 4294967168 }
 0x21b   :  { %71 = vsyncpa [#allocation3], 1 }

</bundles_post_ra>
